<compile_context>
chip_gen: v5e
topology: v5e:2x2
jax: 0.10.0
libtpu: 0.0.40
codegen_flags: <defaults>
</compile_context>

<pallas_src>
import math

import jax
import jax.numpy as jnp
from jax.experimental import pallas as pl
from jax.experimental.pallas import tpu as pltpu


def _round_up(v, m):
    return ((v + m - 1) // m) * m


# ---------------------------------------------------------------------------
# Kernels: one K-step of  out[i,j] += x_tile(bf16) @ w_tile(int8 -> bf16)
# with a resident f32 VMEM accumulator; init at k==0, bias-add/store at last k.
# ---------------------------------------------------------------------------
def _binary_linear_bias_kernel(x_ref, w_ref, b_ref, o_ref, acc_ref):
    @pl.when(pl.program_id(2) == 0)
    def _():
        acc_ref[...] = jnp.zeros_like(acc_ref)

    # bf16 x bf16 -> f32 on the MXU; the int8 -> bf16 upcast of the weight
    # tile is a cheap VPU op hidden under the matmul / weight DMA.
    acc_ref[...] += jnp.dot(
        x_ref[...],
        w_ref[...].astype(jnp.bfloat16),
        preferred_element_type=jnp.float32,
    )

    @pl.when(pl.program_id(2) == pl.num_programs(2) - 1)
    def _():
        o_ref[...] = (acc_ref[...] + b_ref[...]).astype(o_ref.dtype)


def _binary_linear_nobias_kernel(x_ref, w_ref, o_ref, acc_ref):
    @pl.when(pl.program_id(2) == 0)
    def _():
        acc_ref[...] = jnp.zeros_like(acc_ref)

    acc_ref[...] += jnp.dot(
        x_ref[...],
        w_ref[...].astype(jnp.bfloat16),
        preferred_element_type=jnp.float32,
    )

    @pl.when(pl.program_id(2) == pl.num_programs(2) - 1)
    def _():
        o_ref[...] = acc_ref[...].astype(o_ref.dtype)


# ---------------------------------------------------------------------------
# Tiling / VMEM budget
# ---------------------------------------------------------------------------
def _choose_tiles(B, K, N):
    """Lane-dense, MXU-friendly tiles that shrink gracefully for tiny layers."""
    tm = min(512, _round_up(max(B, 1), 16))    # batch tile (bf16 sublane pack)
    tk = min(2048, _round_up(K, 128))          # reduction tile
    tn = min(512, _round_up(N, 128))           # output-feature tile (lanes)

    Bp = _round_up(B, tm)
    Np = _round_up(N, tn)
    # v7x has 2 TensorCores which shard "parallel" grid axes.  If the batch
    # axis collapses to a single block, split the out-feature axis so it has
    # at least 2 blocks and the second core does not idle.
    if Bp // tm == 1 and Np // tn == 1 and Np >= 256:
        tn = max(128, ((Np // 2) // 128) * 128)
    return tm, tk, tn


def _vmem_limit_bytes(tm, tk, tn, out_bytes):
    # Double-buffered x (bf16) + w (int8) + bias (f32) + out tiles, plus the
    # resident f32 accumulator; 2x margin, capped at 40 MiB so the same
    # config stays safe on v7x's 64 MiB VMEM per TensorCore.
    footprint = 2 * (tm * tk * 2 + tk * tn * 1 + tn * 4 + tm * tn * out_bytes)
    footprint += tm * tn * 4
    return int(min(40 << 20, max(32 << 20, 2 * footprint)))


# ---------------------------------------------------------------------------
# Wrapper
# ---------------------------------------------------------------------------
def prepack_binary_weight(weight, Kp, Np):
    """sign(W).T stored as int8, zero-padded to (Kp, Np). {-1,0,+1} exact."""
    N, K = weight.shape
    w = jnp.sign(weight).astype(jnp.int8).T            # (K, N)
    return jnp.pad(w, ((0, Kp - K), (0, Np - N)))


def _binary_linear_packed(x, w_packed, bias, n_out, tm, tk, tn):
    B, K = x.shape
    Kp, Np = w_packed.shape
    out_dtype = x.dtype
    Bp = _round_up(B, tm)

    # bf16 activations: native MXU operand dtype, halves x DMA bytes.  Padded
    # rows/cols are zero and contribute exactly 0 to the dot.
    x_p = jnp.pad(x.astype(jnp.bfloat16), ((0, Bp - B), (0, Kp - K)))

    grid = (Bp // tm, Np // tn, Kp // tk)
    gi, gj, gk = grid

    out_bytes = jnp.dtype(out_dtype).itemsize
    cost = pl.CostEstimate(
        flops=2 * Bp * Np * Kp,
        transcendentals=0,
        # x is re-read once per out-feature block, w once per batch block.
        bytes_accessed=int(x_p.size * 2 * gj
                           + w_packed.size * 1 * gi
                           + Bp * Np * out_bytes),
    )
    cparams = pltpu.CompilerParams(
        dimension_semantics=("parallel", "parallel", "arbitrary"),
        vmem_limit_bytes=_vmem_limit_bytes(tm, tk, tn, out_bytes),
    )

    x_spec = pl.BlockSpec((tm, tk), lambda i, j, k: (i, k))
    w_spec = pl.BlockSpec((tk, tn), lambda i, j, k: (k, j))
    o_spec = pl.BlockSpec((tm, tn), lambda i, j, k: (i, j))
    scratch = [pltpu.VMEM((tm, tn), jnp.float32)]

    if bias is not None:
        b_p = jnp.pad(bias.astype(jnp.float32),
                      (0, Np - bias.shape[0])).reshape(1, Np)
        out = pl.pallas_call(
            _binary_linear_bias_kernel,
            out_shape=jax.ShapeDtypeStruct((Bp, Np), out_dtype),
            grid_spec=pltpu.PrefetchScalarGridSpec(
                num_scalar_prefetch=0,
                grid=grid,
                in_specs=[x_spec, w_spec,
                          pl.BlockSpec((1, tn), lambda i, j, k: (0, j))],
                out_specs=o_spec,
                scratch_shapes=scratch,
            ),
            compiler_params=cparams,
            cost_estimate=cost,
        )(x_p, w_packed, b_p)
    else:
        out = pl.pallas_call(
            _binary_linear_nobias_kernel,
            out_shape=jax.ShapeDtypeStruct((Bp, Np), out_dtype),
            grid_spec=pltpu.PrefetchScalarGridSpec(
                num_scalar_prefetch=0,
                grid=grid,
                in_specs=[x_spec, w_spec],
                out_specs=o_spec,
                scratch_shapes=scratch,
            ),
            compiler_params=cparams,
            cost_estimate=cost,
        )(x_p, w_packed)

    return out[:B, :n_out]


def binary_linear(x, weight, bias=None):
    """Functional form: x @ sign(weight).T (+ bias), f32 accumulation.

    Prepacks the weight on every call; prefer the BinaryLinear class below,
    which caches the packed weight across forward calls.
    """
    B, K = x.shape
    N, K2 = weight.shape
    assert K == K2, "in_features mismatch"
    tm, tk, tn = _choose_tiles(B, K, N)
    Kp, Np = _round_up(K, tk), _round_up(N, tn)
    w_packed = prepack_binary_weight(weight, Kp, Np)
    return _binary_linear_packed(x, w_packed, bias, N, tm, tk, tn)


class BinaryLinear:
    """JAX mirror of the PyTorch BinaryLinear module (forward only)."""

    def __init__(self, in_features, out_features, bias=True, *, key):
        self.in_features = in_features
        self.out_features = out_features
        wkey, _ = jax.random.split(key)
        # weight.data.normal_(0, sqrt(1/in_features))
        self.weight = (jax.random.normal(
            wkey, (out_features, in_features), dtype=jnp.float32)
            * math.sqrt(1.0 / in_features))
        # bias.data.zero_()
        self.bias = (jnp.zeros((out_features,), dtype=jnp.float32)
                     if bias else None)
        # Cache of sign(W).T packed as int8 and padded, keyed by padded dims.
        self._packed_cache = {}

    def _packed_weight(self, Kp, Np):
        key = (Kp, Np)
        if key not in self._packed_cache:
            self._packed_cache[key] = prepack_binary_weight(self.weight, Kp, Np)
        return self._packed_cache[key]

    def __call__(self, x):
        B, K = x.shape
        assert K == self.in_features, "in_features mismatch"
        tm, tk, tn = _choose_tiles(B, K, self.out_features)
        Kp = _round_up(K, tk)
        Np = _round_up(self.out_features, tn)
        w_packed = self._packed_weight(Kp, Np)
        return _binary_linear_packed(x, w_packed, self.bias,
                                     self.out_features, tm, tk, tn)


if __name__ == "__main__":
    key = jax.random.PRNGKey(0)
    k_x, k_mod = jax.random.split(key)

    batch, in_features, out_features = 8, 32, 64
    x = jax.random.normal(k_x, (batch, in_features), dtype=jnp.float32)

    # With bias.
    layer = BinaryLinear(in_features, out_features, bias=True, key=k_mod)
    out = jax.block_until_ready(layer(x))
    assert out.shape == (batch, out_features)

    # Exact reference for the bf16-activation MXU path (sign(W) is exact in
    # bf16; products and f32 accumulation are exact up to reduction order).
    x_bf = x.astype(jnp.bfloat16).astype(jnp.float32)
    ref = x_bf @ jnp.sign(layer.weight).T + layer.bias
    assert jnp.allclose(out, ref, atol=1e-4, rtol=1e-4)

    # Loose sanity check against the full-f32 reference (only x's bf16
    # truncation differs).
    ref_f32 = x @ jnp.sign(layer.weight).T + layer.bias
    assert jnp.allclose(out, ref_f32, atol=5e-1, rtol=5e-2)

    # Second call hits the cached packed weight and must match exactly.
    out2 = jax.block_until_ready(layer(x))
    assert jnp.allclose(out, out2)

    # Without bias.
    layer_nb = BinaryLinear(in_features, out_features, bias=False, key=k_mod)
    out_nb = jax.block_until_ready(layer_nb(x))
    ref_nb = x_bf @ jnp.sign(layer_nb.weight).T
    assert jnp.allclose(out_nb, ref_nb, atol=1e-4, rtol=1e-4)

    print("KERNEL_OK")
</pallas_src>

<mosaic_0001>
module attributes {stable_mosaic.version = 11 : i64} {
  func.func @_binary_linear_bias_kernel(%arg0: i32, %arg1: i32, %arg2: i32, %arg3: memref<16x128xbf16, #tpu.memory_space<vmem>>, %arg4: memref<128x128xi8, #tpu.memory_space<vmem>>, %arg5: memref<1x128xf32, #tpu.memory_space<vmem>>, %arg6: memref<16x128xf32, #tpu.memory_space<vmem>>, %arg7: memref<16x128xf32, #tpu.memory_space<vmem>>) attributes {dimension_semantics = [#tpu.dimension_semantics<parallel>, #tpu.dimension_semantics<parallel>, #tpu.dimension_semantics<arbitrary>], iteration_bounds = array<i64: 1, 1, 1>, scalar_prefetch = 0 : i64, scratch_operands = 1 : i64, tpu.core_type = #tpu.core_type<tc>, window_params = [{transform_indices = @transform_0, window_bounds = array<i64: 16, 128>}, {transform_indices = @transform_1, window_bounds = array<i64: 128, 128>}, {transform_indices = @transform_2, window_bounds = array<i64: 1, 128>}, {transform_indices = @transform_3, window_bounds = array<i64: 16, 128>}]} {
    %c0_i32 = arith.constant 0 : i32
    %0 = arith.cmpi eq, %arg2, %c0_i32 : i32
    %1 = arith.extui %0 : i1 to i32
    %c0_i32_0 = arith.constant 0 : i32
    %2 = arith.cmpi ne, %1, %c0_i32_0 : i32
    scf.if %2 {
      %cst_10 = arith.constant 0.000000e+00 : f32
      %13 = vector.broadcast %cst_10 : f32 to vector<16x128xf32>
      %c0_11 = arith.constant 0 : index
      %c0_12 = arith.constant 0 : index
      %14 = vector.load %arg7[%c0_11, %c0_12] : memref<16x128xf32, #tpu.memory_space<vmem>>, vector<16x128xf32>
      tpu.vector_store %arg7[%c0_11, %c0_12], %13 {strides = array<i32>} : memref<16x128xf32, #tpu.memory_space<vmem>>, vector<16x128xf32>,
    } else {
    }
    %c0 = arith.constant 0 : index
    %c0_1 = arith.constant 0 : index
    %3 = vector.load %arg7[%c0, %c0_1] : memref<16x128xf32, #tpu.memory_space<vmem>>, vector<16x128xf32>
    %c0_2 = arith.constant 0 : index
    %c0_3 = arith.constant 0 : index
    %4 = vector.load %arg3[%c0_2, %c0_3] : memref<16x128xbf16, #tpu.memory_space<vmem>>, vector<16x128xbf16>
    %c0_4 = arith.constant 0 : index
    %c0_5 = arith.constant 0 : index
    %5 = vector.load %arg4[%c0_4, %c0_5] : memref<128x128xi8, #tpu.memory_space<vmem>>, vector<128x128xi8>
    %6 = arith.sitofp %5 : vector<128x128xi8> to vector<128x128xbf16>
    %cst = arith.constant dense<0.000000e+00> : vector<16x128xf32>
    %7 = tpu.matmul %4, %6, %cst {dimension_numbers = #tpu.dot_dimension_numbers<[1], [0], [0], [1], [0, 0, 1, 1], [], []>} : vector<16x128xbf16>, vector<128x128xbf16>, vector<16x128xf32> -> vector<16x128xf32>
    %8 = arith.addf %3, %7 : vector<16x128xf32>
    %c0_6 = arith.constant 0 : index
    %c0_7 = arith.constant 0 : index
    %9 = vector.load %arg7[%c0_6, %c0_7] : memref<16x128xf32, #tpu.memory_space<vmem>>, vector<16x128xf32>
    tpu.vector_store %arg7[%c0_6, %c0_7], %8 {strides = array<i32>} : memref<16x128xf32, #tpu.memory_space<vmem>>, vector<16x128xf32>,
    %c0_i32_8 = arith.constant 0 : i32
    %10 = arith.cmpi eq, %arg2, %c0_i32_8 : i32
    %11 = arith.extui %10 : i1 to i32
    %c0_i32_9 = arith.constant 0 : i32
    %12 = arith.cmpi ne, %11, %c0_i32_9 : i32
    scf.if %12 {
      %c0_10 = arith.constant 0 : index
      %c0_11 = arith.constant 0 : index
      %13 = vector.load %arg7[%c0_10, %c0_11] : memref<16x128xf32, #tpu.memory_space<vmem>>, vector<16x128xf32>
      %c0_12 = arith.constant 0 : index
      %c0_13 = arith.constant 0 : index
      %14 = vector.load %arg5[%c0_12, %c0_13] : memref<1x128xf32, #tpu.memory_space<vmem>>, vector<1x128xf32>
      %15 = vector.broadcast %14 : vector<1x128xf32> to vector<16x128xf32>
      %16 = arith.addf %13, %15 : vector<16x128xf32>
      %c0_14 = arith.constant 0 : index
      %c0_15 = arith.constant 0 : index
      %17 = vector.load %arg6[%c0_14, %c0_15] : memref<16x128xf32, #tpu.memory_space<vmem>>, vector<16x128xf32>
      tpu.vector_store %arg6[%c0_14, %c0_15], %16 {strides = array<i32>} : memref<16x128xf32, #tpu.memory_space<vmem>>, vector<16x128xf32>,
    } else {
    }
    return
  }
  func.func @transform_0(%arg0: i32, %arg1: i32, %arg2: i32) -> (i32, i32) {
    %c0_i32 = arith.constant 0 : i32
    return %arg0, %arg2 : i32, i32
  }
  func.func @transform_1(%arg0: i32, %arg1: i32, %arg2: i32) -> (i32, i32) {
    %c0_i32 = arith.constant 0 : i32
    return %arg2, %arg1 : i32, i32
  }
  func.func @transform_2(%arg0: i32, %arg1: i32, %arg2: i32) -> (i32, i32) {
    %c0_i32 = arith.constant 0 : i32
    %c0_i32_0 = arith.constant 0 : i32
    return %c0_i32, %arg1 : i32, i32
  }
  func.func @transform_3(%arg0: i32, %arg1: i32, %arg2: i32) -> (i32, i32) {
    %c0_i32 = arith.constant 0 : i32
    return %arg0, %arg1 : i32, i32
  }
}

</mosaic_0001>

<bundles_post_ra>
// kernel: tpu_custom_call.1
= control target key start
LH: loop header
LB: loop body
LE: loop exit
PB: predicated region body
PF: predicated region fallthrough
CT: control target
= control target key end

     0   :  { %8 = vsyncpa [#allocation4], 0  ;;  %s294_s0 = inlined_call_operand.hbm [shape: bf16[16,128], index: 0, kind: input, shape index: {}]   ;;  %s295_s1 = inlined_call_operand.hbm [shape: s8[128,128], index: 1, kind: input, shape index: {}]   ;;  %s296_s2 = inlined_call_operand.vmem [shape: f32[1,128], index: 2, kind: input, shape index: {}]   ;;  %s297_s3 = inlined_call_operand.hbm [shape: f32[16,128], index: 3, kind: output, shape index: {}]  }
   0x1   :  { %9 = vsyncpa [#allocation7], 0 }
   0x2   :  { %10 = vsyncpa [#allocation5], 0  ;;  %s15_s14 = sshll.u32 %s294_s0, 4  ;;  %s249_s15 = smov [#allocation3]   ;;  %s16_s14 = int_to_ptr.hbm [resolvable:$true] %s15_s14 }
   0x3   :  { %s17_s16 = sshll.u32 %s249_s15, 4  ;;  %s28_s19 = sshll.u32 %s295_s1, 4  ;;  %s18_s16 = int_to_ptr.vmem [resolvable:$true] %s17_s16  ;;  %s29_s19 = int_to_ptr.hbm [resolvable:$true] %s28_s19 }
   0x4   :  { %s250_s20 = smov 64   ;;  %s251_s21 = smov 4  }
   0x5   :  { %23 = dma.hbm_to_vmem [thread:$0]  %s16_s14, 128, %s18_s16, [#allocation4], %s250_s20, %s250_s20, %s251_s21  }
   0x6   :  { %s252_s22 = smov [#allocation6]   ;;  %s253_s24 = smov 128  }
   0x7   :  { %s30_s23 = sshll.u32 %s252_s22, 4  ;;  %s254_s25 = smov 8   ;;  %s31_s23 = int_to_ptr.vmem [resolvable:$true] %s30_s23 }
   0x8   :  { %36 = dma.hbm_to_vmem [thread:$0]  %s29_s19, 512, %s31_s23, [#allocation7], %s253_s24, %s253_s24, %s254_s25  }
   0x9   :  { %243 = dma.done.wait [#allocation4], 128  }
   0xa   :  { %244 = vsyncadd [#allocation4], 4294967168 }
   0xb   :  { %245 = dma.done.wait [#allocation7], 512  }
   0xc   :  { %246 = vsyncadd [#allocation7], 4294966784  ;;  %v60_v0 = vld [vmem:[#allocation6 + $0x18] sm:$0xff]  ;;  %v59_v1 = vld [vmem:[#allocation6 + $0x10] sm:$0xff]  ;;  %s255_s26 = smov [#allocation8]   ;;  %s144_s30 = sshll.u32 %s297_s3, 4  ;;  %s145_s30 = int_to_ptr.hbm [resolvable:$true] %s144_s30 }
   0xd   :  { %v75_v2 = vunpack.c.2.s8 %v60_v0  ;;  %v76_v3 = vunpack.c.3.s8 %v60_v0  ;;  %v73_v4 = vunpack.c.0.s8 %v60_v0  ;;  %v74_v5 = vunpack.c.1.s8 %v60_v0  ;;  %v58_v18 = vld [vmem:[#allocation6 + $0x8] sm:$0xff]  ;;  %v57_v29 = vld [vmem:[#allocation6] sm:$0xff]  ;;  %v162_v44 = vld [vmem:[#allocation3] sm:$0xff]  ;;  %s142_s27 = sshll.u32 %s255_s26, 4  ;;  %s143_s27 = int_to_ptr.vmem [resolvable:$true] %s142_s27 }
   0xe   :  { %v71_v6 = vunpack.c.2.s8 %v59_v1  ;;  %v72_v7 = vunpack.c.3.s8 %v59_v1  ;;  %v69_v13 = vunpack.c.0.s8 %v59_v1  ;;  %v70_v14 = vunpack.c.1.s8 %v59_v1  ;;  %v170_v45 = vld [vmem:[%s296_s2] ss:$0 sm:$0xff] }
   0xf   :  { %v91_v8 = vcvt.s32.f32 %v75_v2  ;;  %v92_v9 = vcvt.s32.f32 %v76_v3  ;;  %v89_v10 = vcvt.s32.f32 %v73_v4  ;;  %v90_v11 = vcvt.s32.f32 %v74_v5 }
  0x10   :  { %v87_v16 = vcvt.s32.f32 %v71_v6  ;;  %v88_v17 = vcvt.s32.f32 %v72_v7  ;;  %v85_v19 = vcvt.s32.f32 %v69_v13  ;;  %v86_v20 = vcvt.s32.f32 %v70_v14 }
  0x11   :  { %v100_v12 = vpack.c.bf16 %v92_v9, %v91_v8  ;;  %v99_v15 = vpack.c.bf16 %v90_v11, %v89_v10  ;;  %v67_v22 = vunpack.c.2.s8 %v58_v18  ;;  %v68_v23 = vunpack.c.3.s8 %v58_v18 }
  0x12   :  { %v98_v21 = vpack.c.bf16 %v88_v17, %v87_v16  ;;  %v97_v24 = vpack.c.bf16 %v86_v20, %v85_v19  ;;  %v65_v27 = vunpack.c.0.s8 %v58_v18  ;;  %v66_v28 = vunpack.c.1.s8 %v58_v18 }
  0x13   :  { %107 = vmatpush.bf16.msra.mxu0 %v100_v12  ;;  %v83_v25 = vcvt.s32.f32 %v67_v22  ;;  %v84_v26 = vcvt.s32.f32 %v68_v23  ;;  %v63_v30 = vunpack.c.2.s8 %v57_v29  ;;  %v64_v34 = vunpack.c.3.s8 %v57_v29 }
  0x14   :  { %v81_v32 = vcvt.s32.f32 %v65_v27  ;;  %v82_v33 = vcvt.s32.f32 %v66_v28  ;;  %v61_v35 = vunpack.c.0.s8 %v57_v29  ;;  %v62_v39 = vunpack.c.1.s8 %v57_v29 }
  0x15   :  { %v96_v31 = vpack.c.bf16 %v84_v26, %v83_v25  ;;  %v79_v37 = vcvt.s32.f32 %v63_v30  ;;  %v80_v38 = vcvt.s32.f32 %v64_v34 }
  0x16   :  { %v95_v36 = vpack.c.bf16 %v82_v33, %v81_v32  ;;  %v77_v41 = vcvt.s32.f32 %v61_v35  ;;  %v78_v42 = vcvt.s32.f32 %v62_v39 }
  0x17   :  { %108 = vmatpush.bf16.msra.mxu0 %v99_v15  ;;  %v94_v40 = vpack.c.bf16 %v80_v38, %v79_v37 }
  0x18   :  { %v93_v43 = vpack.c.bf16 %v78_v42, %v77_v41 }
  0x1b   :  { %109 = vmatpush.bf16.msra.mxu0 %v98_v21 }
  0x1f   :  { %110 = vmatpush.bf16.msra.mxu0 %v97_v24 }
  0x23   :  { %111 = vmatpush.bf16.msra.mxu0 %v96_v31 }
  0x27   :  { %112 = vmatpush.bf16.msra.mxu0 %v95_v36 }
  0x2b   :  { %113 = vmatpush.bf16.msra.mxu0 %v94_v40 }
  0x2f   :  { %114 = vmatpush.bf16.msra.mxu0 %v93_v43 }
  0x32   :  { %115 = vmatmul.bf16.vlgmr.msra.gmra.mxu0 %v162_v44 }
  0xaf   :  { %v116_v46 = vpop.f32.mrf.mxu0 }
  0xb0   :  { %v134_v47 = vadd.f32 %v170_v45, %v116_v46 }
  0xb2   :  { %136 = vst [vmem:[#allocation8] sm:$0xff] %v134_v47 }
  0xb7   :  { %v118_v48 = vpop.f32.mrf.mxu0 }
  0xb8   :  { %v135_v49 = vadd.f32 %v170_v45, %v118_v48 }
  0xba   :  { %137 = vst [vmem:[#allocation8 + $0x8] sm:$0xff] %v135_v49 }
  0xbb   :  { %150 = dma.vmem_to_hbm [thread:$0]  %s143_s27, 256, %s145_s30, [#allocation5], %s253_s24, %s253_s24, %s254_s25  }
  0xbc   :  { %247 = dma.done.wait [#allocation5], 256  }
  0xbd   :  { %248 = vsyncadd [#allocation5], 4294967040 }
  0xbe   :  { %155 = vsyncpa [#allocation4], 1 }
  0xbf   :  { %156 = vsyncpa [#allocation7], 1 }
  0xc0   :  { %157 = vsyncpa [#allocation5], 1 }

</bundles_post_ra>
